<compile_context>
chip_gen: v5e
topology: v5e:2x2
jax: 0.10.0
libtpu: 0.0.40
codegen_flags: <defaults>
</compile_context>

<pallas_src>
import jax
import jax.numpy as jnp
import numpy as np
from jax.experimental import pallas as pl
from jax.experimental.pallas import tpu as pltpu

# ---- module hyper-parameters (from LFB.__init__ defaults / globals) ----------
FFT_SIZE = 512          # global used by the PyTorch module
SAMPLING_RATE = 16000   # global used by the PyTorch module
NUM_MEL_BINS = 23
LOW_FREQ = 20.0
HIGH_FREQ = 0.0
USE_POWER = True
USE_LOG_FBANK = True
SUBTRACT_MEAN = False   # -> _cmvn is a no-op


# ---- parameter construction (glue, plain numpy — deterministic) --------------
def _mel_scale(f):
    return 1127.0 * np.log(1.0 + f / 700.0)


def get_mel_banks(num_bins, window_length_padded, sample_freq, low_freq, high_freq):
    """Replicates LFB.get_mel_banks for vtln_warp_factor == 1.0."""
    assert num_bins > 3 and window_length_padded % 2 == 0
    num_fft_bins = window_length_padded // 2
    nyquist = 0.5 * sample_freq
    if high_freq <= 0.0:
        high_freq += nyquist
    fft_bin_width = sample_freq / window_length_padded
    mel_low = _mel_scale(low_freq)
    mel_high = _mel_scale(high_freq)
    mel_delta = (mel_high - mel_low) / (num_bins + 1)

    b = np.arange(num_bins, dtype=np.float32)[:, None]
    left_mel = mel_low + b * mel_delta
    center_mel = mel_low + (b + 1.0) * mel_delta
    right_mel = mel_low + (b + 2.0) * mel_delta

    mel = _mel_scale(fft_bin_width * np.arange(num_fft_bins, dtype=np.float32))[None, :]
    up_slope = (mel - left_mel) / (center_mel - left_mel)
    down_slope = (right_mel - mel) / (right_mel - center_mel)
    bins = np.maximum(0.0, np.minimum(up_slope, down_slope)).astype(np.float32)
    return bins  # (num_bins, num_fft_bins) = (23, 256)


def make_mel_weight():
    """mel_energies parameter pre-transposed to (256, M).

    The PyTorch module pads one zero column up to 257 to match the spectrum width;
    that column contributes nothing, so we keep the dense 256-wide weight and the
    kernel reads only the first 256 spectrum bins (numerically exact)."""
    bins = get_mel_banks(NUM_MEL_BINS, FFT_SIZE, SAMPLING_RATE, LOW_FREQ, HIGH_FREQ)
    return jnp.asarray(bins.T, dtype=jnp.float32)            # (256, M)


# ---- Pallas kernel ------------------------------------------------------------
def lfb_kernel(eps_ref, x_ref, w_ref, o_ref, mel_carry, d_carry):
    # eps_ref   : (1, 1)        SMEM scalar epsilon
    # x_ref     : (1, tT, 256)  VMEM spectrum tile for (batch b, T-tile jt)
    # w_ref     : (256, M)      VMEM mel weight (constant block, fetched once)
    # o_ref     : (1, tT, 3*M)  VMEM output tile
    # mel_carry : (1, M)        VMEM scratch — last mel row of previous T-tile
    # d_carry   : (1, M)        VMEM scratch — last delta row of previous T-tile
    jt = pl.program_id(1)

    x = x_ref[0]                                   # (tT, 256)
    if USE_POWER:
        x = x * x
    mel = jnp.dot(x, w_ref[...], preferred_element_type=jnp.float32)  # (tT, M)
    if USE_LOG_FBANK:
        mel = jnp.log(jnp.maximum(mel, eps_ref[0, 0]))
    # _cmvn with subtract_mean=False is a no-op (module default).

    tT, m = mel.shape
    row0 = jax.lax.broadcasted_iota(jnp.int32, (tT, m), 0) == 0

    # delta[t] = mel[t] - mel[t-1] with delta clamped to 0 at the first frame of the
    # utterance (matches the cat/shift construction in the PyTorch forward).
    @pl.when(jt == 0)
    def _():                               # first T-tile: clamp to own first row
        mel_carry[...] = mel[0:1, :]

    prev_mel = pltpu.roll(mel, shift=1, axis=0)          # prev[t] = mel[t-1], wraps at 0
    prev_mel = jnp.where(row0, mel_carry[...], prev_mel)  # fix row 0 with the carry
    d = mel - prev_mel

    @pl.when(jt == 0)
    def _():                               # first T-tile: delta_delta[0] = 0
        d_carry[...] = d[0:1, :]

    prev_d = pltpu.roll(d, shift=1, axis=0)
    prev_d = jnp.where(row0, d_carry[...], prev_d)
    dd = d - prev_d

    # Carry the last mel / delta rows into the next T-tile of the same batch element.
    # (At jt == 0 of the next batch element these are overwritten before use.)
    mel_carry[...] = mel[tT - 1:tT, :]
    d_carry[...] = d[tT - 1:tT, :]

    # Direct slice stores — no jnp.concatenate materialization.
    o_ref[0, :, 0:m] = mel
    o_ref[0, :, m:2 * m] = d
    o_ref[0, :, 2 * m:3 * m] = dd


def lfb_forward(spectrum, epsilon, mel_weight, *, t_tile=1024):
    """spectrum: (B, T, F) f32 with F = 257 (or 256), epsilon: (1, 1) f32,
    mel_weight: (256, M) f32."""
    B, T, F = spectrum.shape
    F_used, M = mel_weight.shape
    assert F in (F_used, F_used + 1), (
        f"spectrum freq dim {F} must be {F_used} or {F_used + 1} (FFT_SIZE//2 + 1)")

    # T-tile: multiple of 8 (vreg sublane), <= T.  The last tile may be partial:
    # Pallas clamps the out-of-bounds rows (reads unspecified, writes dropped), and
    # the backward-looking deltas never consume those rows.
    tT = min(int(t_tile), T)
    if tT >= 8:
        tT = (tT // 8) * 8
    nT = pl.cdiv(T, tT)

    out_shape = jax.ShapeDtypeStruct((B, T, 3 * M), jnp.float32)
    return pl.pallas_call(
        lfb_kernel,
        out_shape=out_shape,
        grid=(B, nT),
        in_specs=[
            pl.BlockSpec(memory_space=pltpu.MemorySpace.SMEM),        # epsilon (1,1)
            # Freq block of width 256 always at block 0: the 257th bin has zero mel
            # weight, so dropping it is exact and keeps dense (8,128) tiles without
            # any wrapper-side slice/copy of the spectrum.
            pl.BlockSpec((1, tT, F_used), lambda b, jt: (b, jt, 0)),  # spectrum tile
            pl.BlockSpec((F_used, M), lambda b, jt: (0, 0)),          # mel weight
        ],
        out_specs=pl.BlockSpec((1, tT, 3 * M), lambda b, jt: (b, jt, 0)),
        scratch_shapes=[
            pltpu.VMEM((1, M), jnp.float32),   # mel carry row
            pltpu.VMEM((1, M), jnp.float32),   # delta carry row
        ],
        compiler_params=pltpu.CompilerParams(
            # B parallel (megacore sharding on v7x), T arbitrary (carries state).
            dimension_semantics=("parallel", "arbitrary"),
        ),
    )(epsilon, spectrum, mel_weight)


# ---- pure-JAX reference (for a correctness check) -----------------------------
def lfb_reference(spectrum, epsilon, mel_weight):
    Fw = mel_weight.shape[0]
    x = spectrum[..., :Fw]
    if USE_POWER:
        x = x * x
    mel = jnp.einsum("btf,fm->btm", x, mel_weight)
    if USE_LOG_FBANK:
        mel = jnp.log(jnp.maximum(mel, epsilon[0, 0]))
    prev = jnp.concatenate([mel[:, :1], mel[:, :-1]], axis=1)
    d = mel - prev
    prevd = jnp.concatenate([d[:, :1], d[:, :-1]], axis=1)
    dd = d - prevd
    return jnp.concatenate([mel, d, dd], axis=-1)


if __name__ == "__main__":
    B, T = 2, 160
    F = FFT_SIZE // 2 + 1      # 257 — module's spectrum freq dim
    M = NUM_MEL_BINS

    key = jax.random.PRNGKey(0)
    spectrum = jax.random.normal(key, (B, T, F), dtype=jnp.float32)
    epsilon = jnp.full((1, 1), np.finfo(np.float32).eps, dtype=jnp.float32)
    mel_weight = make_mel_weight()   # (256, M), deterministic from __init__ formulas

    # Small t_tile so the demo exercises the multi-tile delta carry and a partial
    # trailing T-tile; production default is t_tile=1024.
    out = lfb_forward(spectrum, epsilon, mel_weight, t_tile=64)
    out = jax.block_until_ready(out)

    ref = jax.block_until_ready(lfb_reference(spectrum, epsilon, mel_weight))
    assert out.shape == (B, T, 3 * M), out.shape
    np.testing.assert_allclose(np.asarray(out), np.asarray(ref), rtol=2e-5, atol=1e-4)

    print("KERNEL_OK")
</pallas_src>

<mosaic_0001>
module attributes {stable_mosaic.version = 11 : i64} {
  func.func @lfb_kernel(%arg0: i32, %arg1: i32, %arg2: memref<1x1xf32, #tpu.memory_space<smem>>, %arg3: memref<1x64x256xf32, #tpu.memory_space<vmem>>, %arg4: memref<256x23xf32, #tpu.memory_space<vmem>>, %arg5: memref<1x64x69xf32, #tpu.memory_space<vmem>>, %arg6: memref<1x23xf32, #tpu.memory_space<vmem>>, %arg7: memref<1x23xf32, #tpu.memory_space<vmem>>) attributes {dimension_semantics = [#tpu.dimension_semantics<parallel>, #tpu.dimension_semantics<arbitrary>], iteration_bounds = array<i64: 2, 3>, scalar_prefetch = 0 : i64, scratch_operands = 2 : i64, tpu.core_type = #tpu.core_type<tc>, window_params = [{transform_indices = @transform_0, window_bounds = array<i64: 1, 1>}, {transform_indices = @transform_1, window_bounds = array<i64: 1, 64, 256>}, {pipeline_mode = #tpu.pipeline_mode<synchronous>, transform_indices = @transform_2, window_bounds = array<i64: 256, 23>}, {transform_indices = @transform_3, window_bounds = array<i64: 1, 64, 69>}]} {
    %c0 = arith.constant 0 : index
    %c0_0 = arith.constant 0 : index
    %c0_1 = arith.constant 0 : index
    %0 = vector.load %arg3[%c0, %c0_0, %c0_1] : memref<1x64x256xf32, #tpu.memory_space<vmem>>, vector<1x64x256xf32>
    %1 = vector.shape_cast %0 : vector<1x64x256xf32> to vector<64x256xf32>
    %2 = arith.mulf %1, %1 : vector<64x256xf32>
    %c0_2 = arith.constant 0 : index
    %c0_3 = arith.constant 0 : index
    %3 = vector.load %arg4[%c0_2, %c0_3] : memref<256x23xf32, #tpu.memory_space<vmem>>, vector<256x23xf32>
    %cst = arith.constant dense<0.000000e+00> : vector<64x23xf32>
    %4 = tpu.matmul %2, %3, %cst {dimension_numbers = #tpu.dot_dimension_numbers<[1], [0], [0], [1], [0, 0, 1, 1], [], []>} : vector<64x256xf32>, vector<256x23xf32>, vector<64x23xf32> -> vector<64x23xf32>
    %c0_4 = arith.constant 0 : index
    %c0_5 = arith.constant 0 : index
    %5 = memref.load %arg2[%c0_4, %c0_5] : memref<1x1xf32, #tpu.memory_space<smem>>
    %6 = vector.broadcast %5 : f32 to vector<64x23xf32>
    %7 = arith.maximumf %4, %6 : vector<64x23xf32>
    %8 = math.log %7 : vector<64x23xf32>
    %9 = tpu.iota {dimensions = array<i32: 0>} : vector<64x23xi32>
    %c0_i32 = arith.constant 0 : i32
    %10 = vector.broadcast %c0_i32 : i32 to vector<64x23xi32>
    %11 = arith.cmpi eq, %9, %10 : vector<64x23xi32>
    %c0_i32_6 = arith.constant 0 : i32
    %12 = arith.cmpi eq, %arg1, %c0_i32_6 : i32
    %13 = arith.extui %12 : i1 to i32
    %c0_i32_7 = arith.constant 0 : i32
    %14 = arith.cmpi ne, %13, %c0_i32_7 : i32
    scf.if %14 {
      %43 = vector.extract_strided_slice %8 {offsets = [0, 0], sizes = [1, 23], strides = [1, 1]} : vector<64x23xf32> to vector<1x23xf32>
      %c0_26 = arith.constant 0 : index
      %c0_27 = arith.constant 0 : index
      %44 = vector.load %arg6[%c0_26, %c0_27] : memref<1x23xf32, #tpu.memory_space<vmem>>, vector<1x23xf32>
      tpu.vector_store %arg6[%c0_26, %c0_27], %43 {strides = array<i32>} : memref<1x23xf32, #tpu.memory_space<vmem>>, vector<1x23xf32>,
    } else {
    }
    %c1_i32 = arith.constant 1 : i32
    %15 = tpu.dynamic_rotate %8 by %c1_i32 dim 0 : vector<64x23xf32>, i32 -> vector<64x23xf32>
    %c0_8 = arith.constant 0 : index
    %c0_9 = arith.constant 0 : index
    %16 = vector.load %arg6[%c0_8, %c0_9] : memref<1x23xf32, #tpu.memory_space<vmem>>, vector<1x23xf32>
    %17 = vector.shape_cast %16 : vector<1x23xf32> to vector<1x23xf32>
    %18 = vector.broadcast %17 : vector<1x23xf32> to vector<64x23xf32>
    %19 = arith.select %11, %18, %15 : vector<64x23xi1>, vector<64x23xf32>
    %20 = arith.subf %8, %19 : vector<64x23xf32>
    %c0_i32_10 = arith.constant 0 : i32
    %21 = arith.cmpi eq, %arg1, %c0_i32_10 : i32
    %22 = arith.extui %21 : i1 to i32
    %c0_i32_11 = arith.constant 0 : i32
    %23 = arith.cmpi ne, %22, %c0_i32_11 : i32
    scf.if %23 {
      %43 = vector.extract_strided_slice %20 {offsets = [0, 0], sizes = [1, 23], strides = [1, 1]} : vector<64x23xf32> to vector<1x23xf32>
      %c0_26 = arith.constant 0 : index
      %c0_27 = arith.constant 0 : index
      %44 = vector.load %arg7[%c0_26, %c0_27] : memref<1x23xf32, #tpu.memory_space<vmem>>, vector<1x23xf32>
      tpu.vector_store %arg7[%c0_26, %c0_27], %43 {strides = array<i32>} : memref<1x23xf32, #tpu.memory_space<vmem>>, vector<1x23xf32>,
    } else {
    }
    %c1_i32_12 = arith.constant 1 : i32
    %24 = tpu.dynamic_rotate %20 by %c1_i32_12 dim 0 : vector<64x23xf32>, i32 -> vector<64x23xf32>
    %c0_13 = arith.constant 0 : index
    %c0_14 = arith.constant 0 : index
    %25 = vector.load %arg7[%c0_13, %c0_14] : memref<1x23xf32, #tpu.memory_space<vmem>>, vector<1x23xf32>
    %26 = vector.shape_cast %25 : vector<1x23xf32> to vector<1x23xf32>
    %27 = vector.broadcast %26 : vector<1x23xf32> to vector<64x23xf32>
    %28 = arith.select %11, %27, %24 : vector<64x23xi1>, vector<64x23xf32>
    %29 = arith.subf %20, %28 : vector<64x23xf32>
    %30 = vector.extract_strided_slice %8 {offsets = [63, 0], sizes = [1, 23], strides = [1, 1]} : vector<64x23xf32> to vector<1x23xf32>
    %c0_15 = arith.constant 0 : index
    %c0_16 = arith.constant 0 : index
    %31 = vector.load %arg6[%c0_15, %c0_16] : memref<1x23xf32, #tpu.memory_space<vmem>>, vector<1x23xf32>
    tpu.vector_store %arg6[%c0_15, %c0_16], %30 {strides = array<i32>} : memref<1x23xf32, #tpu.memory_space<vmem>>, vector<1x23xf32>,
    %32 = vector.extract_strided_slice %20 {offsets = [63, 0], sizes = [1, 23], strides = [1, 1]} : vector<64x23xf32> to vector<1x23xf32>
    %c0_17 = arith.constant 0 : index
    %c0_18 = arith.constant 0 : index
    %33 = vector.load %arg7[%c0_17, %c0_18] : memref<1x23xf32, #tpu.memory_space<vmem>>, vector<1x23xf32>
    tpu.vector_store %arg7[%c0_17, %c0_18], %32 {strides = array<i32>} : memref<1x23xf32, #tpu.memory_space<vmem>>, vector<1x23xf32>,
    %c0_19 = arith.constant 0 : index
    %c0_20 = arith.constant 0 : index
    %c0_21 = arith.constant 0 : index
    %34 = vector.load %arg5[%c0_19, %c0_20, %c0_21] : memref<1x64x69xf32, #tpu.memory_space<vmem>>, vector<1x64x23xf32>
    %35 = vector.shape_cast %34 : vector<1x64x23xf32> to vector<64x23xf32>
    %36 = vector.shape_cast %8 : vector<64x23xf32> to vector<1x64x23xf32>
    tpu.vector_store %arg5[%c0_19, %c0_20, %c0_21], %36 {strides = array<i32>} : memref<1x64x69xf32, #tpu.memory_space<vmem>>, vector<1x64x23xf32>,
    %c0_22 = arith.constant 0 : index
    %c0_23 = arith.constant 0 : index
    %c23 = arith.constant 23 : index
    %37 = vector.load %arg5[%c0_22, %c0_23, %c23] : memref<1x64x69xf32, #tpu.memory_space<vmem>>, vector<1x64x23xf32>
    %38 = vector.shape_cast %37 : vector<1x64x23xf32> to vector<64x23xf32>
    %39 = vector.shape_cast %20 : vector<64x23xf32> to vector<1x64x23xf32>
    tpu.vector_store %arg5[%c0_22, %c0_23, %c23], %39 {strides = array<i32>} : memref<1x64x69xf32, #tpu.memory_space<vmem>>, vector<1x64x23xf32>,
    %c0_24 = arith.constant 0 : index
    %c0_25 = arith.constant 0 : index
    %c46 = arith.constant 46 : index
    %40 = vector.load %arg5[%c0_24, %c0_25, %c46] : memref<1x64x69xf32, #tpu.memory_space<vmem>>, vector<1x64x23xf32>
    %41 = vector.shape_cast %40 : vector<1x64x23xf32> to vector<64x23xf32>
    %42 = vector.shape_cast %29 : vector<64x23xf32> to vector<1x64x23xf32>
    tpu.vector_store %arg5[%c0_24, %c0_25, %c46], %42 {strides = array<i32>} : memref<1x64x69xf32, #tpu.memory_space<vmem>>, vector<1x64x23xf32>,
    return
  }
  func.func @transform_0(%arg0: i32, %arg1: i32) -> (i32, i32) {
    %c0_i32 = arith.constant 0 : i32
    %c0_i32_0 = arith.constant 0 : i32
    %c0_i32_1 = arith.constant 0 : i32
    return %c0_i32, %c0_i32_0 : i32, i32
  }
  func.func @transform_1(%arg0: i32, %arg1: i32) -> (i32, i32, i32) {
    %c0_i32 = arith.constant 0 : i32
    %c0_i32_0 = arith.constant 0 : i32
    return %arg0, %arg1, %c0_i32 : i32, i32, i32
  }
  func.func @transform_2(%arg0: i32, %arg1: i32) -> (i32, i32) {
    %c0_i32 = arith.constant 0 : i32
    %c0_i32_0 = arith.constant 0 : i32
    %c0_i32_1 = arith.constant 0 : i32
    return %c0_i32, %c0_i32_0 : i32, i32
  }
  func.func @transform_3(%arg0: i32, %arg1: i32) -> (i32, i32, i32) {
    %c0_i32 = arith.constant 0 : i32
    %c0_i32_0 = arith.constant 0 : i32
    return %arg0, %arg1, %c0_i32 : i32, i32, i32
  }
}

</mosaic_0001>

<bundles_post_ra>
// kernel: tpu_custom_call.1
= control target key start
LH: loop header
LB: loop body
LE: loop exit
PB: predicated region body
PF: predicated region fallthrough
CT: control target
= control target key end

     0   :  { %s1740_s0 = inlined_call_operand.<no memory space> [shape: f32[1,1], index: 0, kind: input, shape index: {}]   ;;  %s1741_s1 = inlined_call_operand.hbm [shape: f32[2,160,257], index: 1, kind: input, shape index: {}]   ;;  %s1742_s2 = inlined_call_operand.vmem [shape: f32[256,23], index: 2, kind: input, shape index: {}]   ;;  %s1743_s3 = inlined_call_operand.vmem [shape: f32[2,160,69], index: 3, kind: output, shape index: {}]  }
   0x1   :  { %8 = sst [smem:[#allocation4]] %s1740_s0 }
   0x2   :  { %9 = vsyncpa [#allocation6], 0 }
   0x3   :  { %11 = vsyncpa [#allocation6 + $0x1], 0  ;;  %s1292_s14 = smov 0   ;;  %s1294_s15 = smov 0  }
   0x4   :  { %s1296_s16 = smov 0   ;;  %s1298_s17 = smov 0  }
   0x5   :  { %s1300_s18 = smov 0   ;;  %s1302_s19 = smov 0  }
   0x6   :  { %s1304_s20 = smov 0   ;;  %s1306_s21 = smov 0  }
   0x7 LB: > { %s26_s0 = sadd.s32 1, %s1221_s19  ;;  %s29_s22 = sadd.s32 1, %s1225_s20  ;;  %s1229_s21 = sphi %s1306_s21, %s17_s21   ;;  %s1225_s20 = sphi %s1304_s20, %s1760_s20   ;;  %s1221_s19 = sphi %s1302_s19, %s1759_s19   ;;  %s1217_s18 = sphi %s1300_s18, %s1758_s18   ;;  %s1213_s17 = sphi %s1298_s17, %s1757_s17   ;;  %s1209_s16 = sphi %s1296_s16, %s1756_s16   ;;  %s1205_s15 = sphi %s1294_s15, %s1755_s15   ;;  %s1201_s14 = sphi %s1292_s14, %s1754_s14  }
   0x8   : > { %p27_p0 = scmp.ge.s32.totalorder %s26_s0, 3  ;;  %s867_s23 = sadd.s32 4294967295, %s1229_s21  }
   0x9   : > { %p66_p1 = scmp.ne.s32.totalorder %s1209_s16, %s1205_s15  ;;  %p67_p2 = scmp.eq.s32.totalorder %s1229_s21, 0 }
   0xa   : > { %s1762_s0 = smov (%p27_p0, %s26_s0), 0  ;;  %s1764_s22 = smov (!%p27_p0, %s29_s22), %s1225_s20 }
   0xb   : > { %s55_s24 = ssub.s32 %s1221_s19, %s1762_s0  ;;  %p31_p3 = scmp.ge.s32.totalorder %s1764_s22, 2 }
   0xc   : > { %p72_p4 = scmp.ne.s32.totalorder %s1205_s15, %s1201_s14  ;;  %p68_p5 = por %p67_p2, %p66_p1 }
   0xd   : > { %p73_p6 = scmp.eq.s32.totalorder %s867_s23, 0  ;;  %s1766_s22 = smov (%p31_p3, %s1764_s22), 0 }
   0xe   : > { %1745 = sst [smem:[#allocation9_spill]] %s1766_s22  ;;  %p119_p8 = scmp.eq.s32.totalorder %s867_s23, 5 }
   0xf   : > { %p1347_p7 = por %p73_p6, %p72_p4  ;;  %s54_s26 = ssub.s32 %s1225_s20, %s1766_s22 }
  0x10   : > { %s59_s27 = sadd.s32 1, %s1209_s16  ;;  %s56_s28 = sor.u32 %s55_s24, %s54_s26 }
  0x11   : > { %p1357_p9 = por %p119_p8, %p66_p1  ;;  %p57_p10 = scmp.eq.s32.totalorder %s56_s28, 0 }
  0x12   : > { %p870_p11 = scmp.ge.s32.totalorder %s1229_s21, 6 }
  0x13   : > { %s1362_s30 = scalar_select %p57_p10, %s1209_s16, %s59_s27  }
  0x14   : > { %147 = sbr.rel (%p870_p11) target bundleno = 66 (0x42), region = 24 }
  0x19   : > { %150 = sbr.rel (!%p68_p5) target bundleno = 66 (0x42), region = 28  ;;  %s151_s4 = sand.u32 (%p68_p5), 1, %s1209_s16  }
  0x1a   : > { %s872_s5 = sshll.u32 (%p68_p5), %s1221_s19, 3  ;;  %s871_s6 = sshll.u32 (%p68_p5), %s151_s4, 7 }
  0x1b   : > { %s157_s7 = ssub.s32 (%p68_p5), 20, %s872_s5  ;;  %s1370_s11 = scalar_lea.sflag (%p68_p5), [#allocation6], %s151_s4 }
  0x1c   : > { %p158_p12 = scmp.lt.s32.totalorder (%p68_p5), %s157_s7, 8  ;;  %s155_s12 = scalar_lea.vmem (%p68_p5), [#allocation5], %s871_s6 }
  0x1e   : > { %s1768_s7 = smov (!%p158_p12, %s157_s7), 8 }
  0x1f   : > { %s902_s8 = sshll.u32 %s1768_s7, 4 }
  0x20   : > { %s162_s9 = ssub.s32 128, %s902_s8 }
  0x21   : > { %s163_s10 = sshll.u32 %s162_s9, 4 }
  0x22   : > { %164 = vsyncadd %s1370_s11, %s163_s10  ;;  %p1373_p13 = scmp.ne.s32.totalorder %s902_s8, 0  ;;  %s937_s14 = smul.u32 24, %s1221_s19 }
  0x23   : > { %s938_s23 = smul.u32 60, %s1225_s20  ;;  %s1379_s24 = sshll.u32 %s155_s12, 4  ;;  %s175_s24 = int_to_ptr.vmem [resolvable:$true] %s1379_s24 }
  0x24   : > { %s879_s26 = sshll.u32 %s1768_s7, 8 }
  0x25   : > { %s168_s27 = sadd.s32 %s938_s23, %s937_s14  ;;  %s1094_s10 = sshrl.u32 %s879_s26, 4 }
  0x26   : > { %s877_s28 = sshll.u32 %s168_s27, 3  ;;  %s1103_s23 = scalar_lea.hbm %s1741_s1, 960 }
  0x27   : > { %s170_s6 = scalar_lea.hbm %s1741_s1, %s877_s28 }
  0x28   : > { %s172_s9 = sshll.u32 %s170_s6, 4  ;;  %s1386_s9 = int_to_ptr.hbm [resolvable:$true] %s172_s9 }
  0x29   : > { %s1092_s8 = sshra.s32 %s1386_s9, 4  ;;  %s1093_s8 = int_to_ptr.hbm [resolvable:$true] %s1092_s8 }
  0x2a   : > { %s1099_s22 = scalar_lea.hbm %s1093_s8, %s1094_s10 }
  0x2b   : > { %p1100_p0 = scmp.ne.s32.totalorder %s1093_s8, %s1099_s22  ;;  %p1105_p3 = scmp.lt.s32.totalorder %s1103_s23, %s1099_s22 }
  0x2d   : > { %p1101_p1 = pnand %p1100_p0, %p1373_p13 }
  0x2f   : > { %p1102_p2 = pneg %p1101_p1 }
  0x31   : > { %p1107_p4 = pnand %p1105_p3, %p1102_p2 }
  0x33   : > { %1110 = shalt.err (!%p1107_p4)
}
  0x34   : > { %s1111_s27 = sshra.s32 %s175_s24, 4  ;;  %s1263_s4 = smov [#allocation5]   ;;  %s1112_s27 = int_to_ptr.vmem [resolvable:$true] %s1111_s27 }
  0x35   : > { %s1118_s28 = scalar_lea.vmem %s1112_s27, %s1094_s10  ;;  %s1122_s5 = scalar_lea.vmem %s1263_s4, 256 }
  0x36   : > { %p1119_p5 = scmp.ne.s32.totalorder %s1112_s27, %s1118_s28  ;;  %p1124_p10 = scmp.lt.s32.totalorder %s1122_s5, %s1118_s28 }
  0x38   : > { %p1120_p6 = pnand %p1119_p5, %p1373_p13 }
  0x3a   : > { %p1121_p8 = pneg %p1120_p6 }
  0x3c   : > { %p1126_p11 = pnand %p1124_p10, %p1121_p8 }
  0x3e   : > { %1129 = shalt.err (!%p1126_p11)
}
  0x3f   : > { %s1264_s6 = smov 384   ;;  %s1265_s22 = smov 256  }
  0x40   : > { %s1266_s8 = smov 16  }
  0x41   : > { %180 = dma.hbm_to_vmem [thread:$0]  (%p1373_p13), %s1386_s9, %s879_s26, %s175_s24, %s1370_s11, %s1264_s6, %s1265_s22, %s1266_s8  }
  0x42 PF: > { %p880_p12 = scmp.ge.s32.totalorder %s1229_s21, 1  ;;  %p182_p0 = scmp.lt.s32.totalorder %s1229_s21, 7 }
  0x44   : > { %p183_p1 = pnand %p880_p12, %p182_p0 }
  0x45   : > { %s1411_s10 = sand.u32 (!%p183_p1), 1, %s1205_s15  }
  0x46   : > { %186 = sbr.rel (%p183_p1) target bundleno = 489 (0x1e9), region = 32  ;;  %s881_s12 = sshll.u32 (!%p183_p1), %s1411_s10, 7 }
  0x47   : > { %s189_s14 = scalar_lea.sflag (!%p183_p1), [#allocation6], %s1411_s10  ;;  %s1415_s13 = scalar_lea.vmem (!%p183_p1), [#allocation5], %s881_s12 }
  0x4b   : > { %1196 = dma.done.wait (%p1347_p7), %s189_s14, 2048  }
  0x4c   : > { %1198 = vsyncadd (%p1347_p7), %s189_s14, 4294965248  ;;  %s882_s7 = sshll.u32 %s1411_s10, 6  ;;  %v273_v0 = vld [vmem:[%s1742_s2 + $0x78] sm:$0xff]  ;;  %v272_v2 = vld [vmem:[%s1742_s2 + $0x70] sm:$0xff]  ;;  %s372_s23 = sld [smem:[#allocation4]] }
  0x4d   : > { %v289_v1 = vld [vmem:[%s1742_s2 + $0xf8] sm:$0xff]  ;;  %905 = vmatpush.msra.mxu2 %v273_v0  ;;  %v288_v3 = vld [vmem:[%s1742_s2 + $0xf0] sm:$0xff]  ;;  %v271_v4 = vld [vmem:[%s1742_s2 + $0x68] sm:$0xff]  ;;  %290 = vmatpush.msra.mxu0 %v273_v0  ;;  %p883_p7 = scmp.ne.s32.totalorder %s1213_s17, 0 }
  0x4e   : > { %921 = vmatpush.msra.mxu3 %v289_v1  ;;  %v287_v5 = vld [vmem:[%s1742_s2 + $0xe8] sm:$0xff]  ;;  %331 = vmatpush.msra.mxu1 %v289_v1  ;;  %v270_v6 = vld [vmem:[%s1742_s2 + $0x60] sm:$0xff]  ;;  %v269_v8 = vld [vmem:[%s1742_s2 + $0x58] sm:$0xff] }
  0x4f   : > { %906 = vmatpush.msra.mxu2 %v272_v2  ;;  %v286_v7 = vld [vmem:[%s1742_s2 + $0xe0] sm:$0xff]  ;;  %291 = vmatpush.msra.mxu0 %v272_v2  ;;  %v285_v9 = vld [vmem:[%s1742_s2 + $0xd8] sm:$0xff]  ;;  %v268_v10 = vld [vmem:[%s1742_s2 + $0x50] sm:$0xff] }
  0x50   : > { %922 = vmatpush.msra.mxu3 %v288_v3  ;;  %332 = vmatpush.msra.mxu1 %v288_v3  ;;  %v284_v11 = vld [vmem:[%s1742_s2 + $0xd0] sm:$0xff]  ;;  %v267_v12 = vld [vmem:[%s1742_s2 + $0x48] sm:$0xff]  ;;  %v266_v14 = vld [vmem:[%s1742_s2 + $0x40] sm:$0xff] }
  0x51   : > { %907 = vmatpush.msra.mxu2 %v271_v4  ;;  %292 = vmatpush.msra.mxu0 %v271_v4  ;;  %v283_v13 = vld [vmem:[%s1742_s2 + $0xc8] sm:$0xff]  ;;  %v282_v15 = vld [vmem:[%s1742_s2 + $0xc0] sm:$0xff]  ;;  %v265_v16 = vld [vmem:[%s1742_s2 + $0x38] sm:$0xff] }
  0x52   : > { %923 = vmatpush.msra.mxu3 %v287_v5  ;;  %333 = vmatpush.msra.mxu1 %v287_v5  ;;  %v281_v17 = vld [vmem:[%s1742_s2 + $0xb8] sm:$0xff]  ;;  %v264_v18 = vld [vmem:[%s1742_s2 + $0x30] sm:$0xff]  ;;  %v263_v20 = vld [vmem:[%s1742_s2 + $0x28] sm:$0xff]  ;;  %v373_v2 = vstv %s372_s23 }
  0x53   : > { %908 = vmatpush.msra.mxu2 %v270_v6  ;;  %293 = vmatpush.msra.mxu0 %v270_v6  ;;  %v280_v19 = vld [vmem:[%s1742_s2 + $0xb0] sm:$0xff]  ;;  %v279_v21 = vld [vmem:[%s1742_s2 + $0xa8] sm:$0xff]  ;;  %v262_v22 = vld [vmem:[%s1742_s2 + $0x20] sm:$0xff] }
  0x54   : > { %924 = vmatpush.msra.mxu3 %v286_v7  ;;  %334 = vmatpush.msra.mxu1 %v286_v7  ;;  %v278_v23 = vld [vmem:[%s1742_s2 + $0xa0] sm:$0xff]  ;;  %v261_v24 = vld [vmem:[%s1742_s2 + $0x18] sm:$0xff]  ;;  %v260_v26 = vld [vmem:[%s1742_s2 + $0x10] sm:$0xff]  ;;  %v398_v7 = vlaneseq }
  0x55   : > { %909 = vmatpush.msra.mxu2 %v269_v8  ;;  %294 = vmatpush.msra.mxu0 %v269_v8  ;;  %v277_v25 = vld [vmem:[%s1742_s2 + $0x98] sm:$0xff]  ;;  %v276_v27 = vld [vmem:[%s1742_s2 + $0x90] sm:$0xff]  ;;  %v234_v28 = vld [vmem:[%s1415_s13 + $0x40] sm:$0xff] }
  0x56   : > { %925 = vmatpush.msra.mxu3 %v285_v9  ;;  %335 = vmatpush.msra.mxu1 %v285_v9  ;;  %v235_v29 = vld [vmem:[%s1415_s13 + $0x48] sm:$0xff]  ;;  %v226_v32 = vld [vmem:[%s1415_s13] sm:$0xff]  ;;  %v250_v36 = vmul.f32 %v234_v28, %v234_v28  ;;  %v236_v40 = vld [vmem:[%s1415_s13 + $0x50] sm:$0xff]  ;;  %v1534_v9 = vshrl.u32 %v398_v7, 7 }
  0x57   : > { %910 = vmatpush.msra.mxu2 %v268_v10  ;;  %295 = vmatpush.msra.mxu0 %v268_v10  ;;  %v259_v30 = vld [vmem:[%s1742_s2 + $0x8] sm:$0xff]  ;;  %v258_v34 = vld [vmem:[%s1742_s2] sm:$0xff]  ;;  %v251_v37 = vmul.f32 %v235_v29, %v235_v29  ;;  %v242_v38 = vmul.f32 %v226_v32, %v226_v32  ;;  %v228_v42 = vld [vmem:[%s1415_s13 + $0x10] sm:$0xff]  ;;  %v252_v44 = vmul.f32 %v236_v40, %v236_v40 }
  0x58   : > { %926 = vmatpush.msra.mxu3 %v284_v11  ;;  %336 = vmatpush.msra.mxu1 %v284_v11  ;;  %v275_v31 = vld [vmem:[%s1742_s2 + $0x88] sm:$0xff]  ;;  %v274_v35 = vld [vmem:[%s1742_s2 + $0x80] sm:$0xff]  ;;  %v244_v46 = vmul.f32 %v228_v42, %v228_v42  ;;  %v240_v56 = vld [vmem:[%s1415_s13 + $0x70] sm:$0xff]  ;;  %vm407_vm0 = vcmp.eq.s32.totalorder %v1534_v9, 0 }
  0x59   : > { %911 = vmatpush.msra.mxu2 %v267_v12  ;;  %296 = vmatpush.msra.mxu0 %v267_v12  ;;  %v227_v33 = vld [vmem:[%s1415_s13 + $0x8] sm:$0xff]  ;;  %v237_v41 = vld [vmem:[%s1415_s13 + $0x58] sm:$0xff]  ;;  %v238_v48 = vld [vmem:[%s1415_s13 + $0x60] sm:$0xff]  ;;  %v256_v60 = vmul.f32 %v240_v56, %v240_v56 }
  0x5a   : > { %927 = vmatpush.msra.mxu3 %v283_v13  ;;  %337 = vmatpush.msra.mxu1 %v283_v13  ;;  %v243_v39 = vmul.f32 %v227_v33, %v227_v33  ;;  %v229_v43 = vld [vmem:[%s1415_s13 + $0x18] sm:$0xff]  ;;  %v253_v45 = vmul.f32 %v237_v41, %v237_v41  ;;  %v239_v49 = vld [vmem:[%s1415_s13 + $0x68] sm:$0xff]  ;;  %v230_v50 = vld [vmem:[%s1415_s13 + $0x20] sm:$0xff]  ;;  %v254_v52 = vmul.f32 %v238_v48, %v238_v48 }
  0x5b   : > { %912 = vmatpush.msra.mxu2 %v266_v14  ;;  %297 = vmatpush.msra.mxu0 %v266_v14  ;;  %v245_v47 = vmul.f32 %v229_v43, %v229_v43  ;;  %v231_v51 = vld [vmem:[%s1415_s13 + $0x28] sm:$0xff]  ;;  %v255_v53 = vmul.f32 %v239_v49, %v239_v49  ;;  %v246_v54 = vmul.f32 %v230_v50, %v230_v50  ;;  %v241_v57 = vld [vmem:[%s1415_s13 + $0x78] sm:$0xff]  ;;  %v232_v58 = vld [vmem:[%s1415_s13 + $0x30] sm:$0xff] }
  0x5c   : > { %928 = vmatpush.msra.mxu3 %v282_v15  ;;  %338 = vmatpush.msra.mxu1 %v282_v15  ;;  %v247_v55 = vmul.f32 %v231_v51, %v231_v51  ;;  %v233_v59 = vld [vmem:[%s1415_s13 + $0x38] sm:$0xff]  ;;  %v257_v61 = vmul.f32 %v241_v57, %v241_v57  ;;  %v248_v62 = vmul.f32 %v232_v58, %v232_v58  ;;  %s1555_s13 = scalar_lea.vmem [#allocation7], %s882_s7  }
  0x5d   : > { %913 = vmatpush.msra.mxu2 %v265_v16  ;;  %298 = vmatpush.msra.mxu0 %v265_v16  ;;  %v249_v63 = vmul.f32 %v233_v59, %v233_v59 }
  0x5e   : > { %929 = vmatpush.msra.mxu3 %v281_v17  ;;  %339 = vmatpush.msra.mxu1 %v281_v17 }
  0x5f   : > { %914 = vmatpush.msra.mxu2 %v264_v18  ;;  %299 = vmatpush.msra.mxu0 %v264_v18 }
  0x60   : > { %930 = vmatpush.msra.mxu3 %v280_v19  ;;  %340 = vmatpush.msra.mxu1 %v280_v19 }
  0x61   : > { %915 = vmatpush.msra.mxu2 %v263_v20  ;;  %300 = vmatpush.msra.mxu0 %v263_v20 }
  0x62   : > { %931 = vmatpush.msra.mxu3 %v279_v21  ;;  %341 = vmatpush.msra.mxu1 %v279_v21 }
  0x63   : > { %916 = vmatpush.msra.mxu2 %v262_v22  ;;  %301 = vmatpush.msra.mxu0 %v262_v22 }
  0x64   : > { %932 = vmatpush.msra.mxu3 %v278_v23  ;;  %342 = vmatpush.msra.mxu1 %v278_v23 }
  0x65   : > { %917 = vmatpush.msra.mxu2 %v261_v24  ;;  %302 = vmatpush.msra.mxu0 %v261_v24 }
  0x66   : > { %933 = vmatpush.msra.mxu3 %v277_v25  ;;  %343 = vmatpush.msra.mxu1 %v277_v25 }
  0x67   : > { %918 = vmatpush.msra.mxu2 %v260_v26  ;;  %303 = vmatpush.msra.mxu0 %v260_v26 }
  0x68   : > { %934 = vmatpush.msra.mxu3 %v276_v27  ;;  %344 = vmatpush.msra.mxu1 %v276_v27 }
  0x69   : > { %919 = vmatpush.msra.mxu2 %v259_v30  ;;  %304 = vmatpush.msra.mxu0 %v259_v30 }
  0x6a   : > { %935 = vmatpush.msra.mxu3 %v275_v31  ;;  %345 = vmatpush.msra.mxu1 %v275_v31 }
  0x6b   : > { %920 = vmatpush.msra.mxu2 %v258_v34  ;;  %305 = vmatpush.msra.mxu0 %v258_v34 }
  0x6c   : > { %936 = vmatpush.msra.mxu3 %v274_v35  ;;  %318 = vmatmul.f32.vlgmr.msra.gmra.mxu2 %v250_v36 }
  0x6d   : > { %359 = vmatmul.f32.vlgmr.msra.gmra.mxu3 %v251_v37  ;;  %346 = vmatpush.msra.mxu1 %v274_v35 }
  0x6e   : > { %306 = vmatmul.f32.vlgmr.msra.gmra.mxu0 %v242_v38  ;;  %347 = vmatmul.f32.vlgmr.msra.gmra.mxu1 %v243_v39 }
  0x74   : > { %321 = vmatmul.f32.gmra.mxu2 %v252_v44 }
  0x75   : > { %362 = vmatmul.f32.gmra.mxu3 %v253_v45 }
  0x76   : > { %309 = vmatmul.f32.gmra.mxu0 %v244_v46  ;;  %350 = vmatmul.f32.gmra.mxu1 %v245_v47 }
  0x7c   : > { %324 = vmatmul.f32.gmra.mxu2 %v254_v52 }
  0x7d   : > { %365 = vmatmul.f32.gmra.mxu3 %v255_v53 }
  0x7e   : > { %312 = vmatmul.f32.gmra.mxu0 %v246_v54  ;;  %353 = vmatmul.f32.gmra.mxu1 %v247_v55 }
  0x84   : > { %327 = vmatmul.f32.gmra.mxu2 %v256_v60 }
  0x85   : > { %368 = vmatmul.f32.gmra.mxu3 %v257_v61 }
  0x86   : > { %315 = vmatmul.f32.gmra.mxu0 %v248_v62  ;;  %356 = vmatmul.f32.gmra.mxu1 %v249_v63 }
  0xeb   : > { %v307_v0 = vpop.f32.mrf.mxu0  ;;  %v348_v1 = vpop.f32.mrf.mxu1 }
  0xec   : > { %v349_v3 = vadd.f32 %v348_v1, %v307_v0 }
  0xee   : > { %v374_v4 = vmax.f32 %v349_v3, %v373_v2 }
  0xef   : > { %v319_v5 = vpop.f32.mrf.mxu2 }
  0xf0   : > { %v360_v6 = vpop.f32.mrf.mxu3  ;;  %1074 = vlog2.f32 %v374_v4 }
  0xf1   : > { %v361_v8 = vadd.f32 %v360_v6, %v319_v5 }
  0xf3   : > { %v378_v10 = vmax.f32 %v361_v8, %v373_v2  ;;  %v310_v11 = vpop.f32.mrf.mxu0  ;;  %v351_v12 = vpop.f32.mrf.mxu1 }
  0xf4   : > { %v352_v13 = vadd.f32 %v351_v12, %v310_v11 }
  0xf5   : > { %1076 = vlog2.f32 %v378_v10 }
  0xf6   : > { %v1075_v14 = vpop.eup %1074  ;;  %v375_v15 = vmax.f32 %v352_v13, %v373_v2 }
  0xf7   : > { %v1537_v16 = vmul.f32 0.6931472, %v1075_v14  ;;  %v322_v17 = vpop.f32.mrf.mxu2 }
  0xf8   : > { %v363_v18 = vpop.f32.mrf.mxu3  ;;  %1078 = vlog2.f32 %v375_v15 }
  0xf9   : > { %v364_v19 = vadd.f32 %v363_v18, %v322_v17 }
  0xfb   : > { %v1077_v20 = vpop.eup %1076  ;;  %v379_v21 = vmax.f32 %v364_v19, %v373_v2  ;;  %v313_v23 = vpop.f32.mrf.mxu0 }
  0xfc   : > { %v1539_v22 = vmul.f32 0.6931472, %v1077_v20  ;;  %v354_v24 = vpop.f32.mrf.mxu1 }
  0xfd   : > { %1080 = vlog2.f32 %v379_v21  ;;  %v355_v25 = vadd.f32 %v354_v24, %v313_v23 }
  0xfe   : > { %v1079_v26 = vpop.eup %1078 }
  0xff   : > { %v376_v27 = vmax.f32 %v355_v25, %v373_v2  ;;  %v1541_v28 = vmul.f32 0.6931472, %v1079_v26  ;;  %v325_v29 = vpop.f32.mrf.mxu2 }
 0x100   : > { %v366_v30 = vpop.f32.mrf.mxu3 }
 0x101   : > { %1082 = vlog2.f32 %v376_v27  ;;  %v367_v31 = vadd.f32 %v366_v30, %v325_v29 }
 0x103   : > { %v1081_v32 = vpop.eup %1080  ;;  %v380_v33 = vmax.f32 %v367_v31, %v373_v2  ;;  %v316_v35 = vpop.f32.mrf.mxu0 }
 0x104   : > { %v1543_v34 = vmul.f32 0.6931472, %v1081_v32  ;;  %v357_v36 = vpop.f32.mrf.mxu1 }
 0x105   : > { %1084 = vlog2.f32 %v380_v33  ;;  %v358_v37 = vadd.f32 %v357_v36, %v316_v35 }
 0x107   : > { %v1083_v38 = vpop.eup %1082  ;;  %v377_v39 = vmax.f32 %v358_v37, %v373_v2  ;;  %v328_v41 = vpop.f32.mrf.mxu2 }
 0x108   : > { %v1545_v40 = vmul.f32 0.6931472, %v1083_v38  ;;  %v369_v42 = vpop.f32.mrf.mxu3 }
 0x109   : > { %1086 = vlog2.f32 %v377_v39  ;;  %v370_v43 = vadd.f32 %v369_v42, %v328_v41 }
 0x10b   : > { %v1085_v44 = vpop.eup %1084  ;;  %v381_v45 = vmax.f32 %v370_v43, %v373_v2 }
 0x10c   : > { %v1547_v46 = vmul.f32 0.6931472, %v1085_v44 }
 0x10d   : > { %1088 = vlog2.f32 %v381_v45 }
 0x10f   : > { %v1087_v47 = vpop.eup %1086 }
 0x110   : > { %v1549_v48 = vmul.f32 0.6931472, %v1087_v47  ;;  %418 = sbr.rel (%p883_p7) target bundleno = 279 (0x117), region = 40 }
 0x113   : > { %v1089_v49 = vpop.eup %1088 }
 0x114   : > { %v1551_v50 = vmul.f32 0.6931472, %v1089_v49 }
 0x115   : > { %vm419_vm1 = vcmask 180224  }
 0x116   : > { %420 = vst.msk [vmem:[#allocation2] sm:$0x1] %vm419_vm1, %v1537_v16 }
 0x117 PF: > { %v421_v51 = vrot.slane %v1537_v16, 7  ;;  %v422_v52 = vrot.slane %v1541_v28, 7  ;;  %v423_v53 = vrot.slane %v1545_v40, 7  ;;  %v424_v54 = vrot.slane %v1549_v48, 7 }
 0x118   : > { %v425_v55 = vrot.slane %v1539_v22, 7  ;;  %v426_v56 = vrot.slane %v1543_v34, 7  ;;  %v427_v57 = vrot.slane %v1547_v46, 7  ;;  %v428_v58 = vrot.slane %v1551_v50, 7 }
 0x119   : > { %vm429_vm2 = vcmp.lt.s32.totalorder %v1534_v9, 1 }
 0x11a   : > { %v430_v60 = vsel %vm429_vm2, %v427_v57, %v428_v58  ;;  %v431_v61 = vsel %vm429_vm2, %v426_v56, %v427_v57  ;;  %v432_v62 = vsel %vm429_vm2, %v425_v55, %v426_v56  ;;  %v433_v63 = vsel %vm429_vm2, %v424_v54, %v425_v55 }
 0x11b   : > { %v434_v0 = vsel %vm429_vm2, %v423_v53, %v424_v54  ;;  %v435_v1 = vsel %vm429_vm2, %v422_v52, %v423_v53  ;;  %v436_v2 = vsel %vm429_vm2, %v421_v51, %v422_v52  ;;  %v437_v3 = vsel %vm429_vm2, %v428_v58, %v421_v51  ;;  %460 = sbr.rel (%p883_p7) target bundleno = 290 (0x122), region = 44 }
 0x11c   : > { %v451_v5 = vsub.f32 %v1541_v28, %v436_v2  ;;  %v452_v6 = vsub.f32 %v1545_v40, %v435_v1  ;;  %v453_v7 = vsub.f32 %v1549_v48, %v434_v0  ;;  %v454_v10 = vsub.f32 %v1539_v22, %v433_v63 }
 0x11d   : > { %v1090_v59 = vld [vmem:[#allocation2] ss:$0 sm:$0xff]  ;;  %v455_v11 = vsub.f32 %v1543_v34, %v432_v62  ;;  %v456_v12 = vsub.f32 %v1547_v46, %v431_v61  ;;  %v457_v13 = vsub.f32 %v1551_v50, %v430_v60 }
 0x11e   : > { %v442_v4 = vsel %vm407_vm0, %v1090_v59, %v437_v3 }
 0x11f   : > { %v450_v8 = vsub.f32 %v1537_v16, %v442_v4 }
 0x120   : > { %vm461_vm3 = vcmask 180224  }
 0x121   : > { %462 = vst.msk [vmem:[#allocation3] sm:$0x1] %vm461_vm3, %v450_v8 }
 0x122 PF: > { %s1267_s10 = smov 23   ;;  %v463_v14 = vrot.slane %v450_v8, 7  ;;  %v470_v15 = vrot.slane %v457_v13, 7  ;;  %vm499_vm4 = vcmask 187399   ;;  %v464_v20 = vrot.slane %v451_v5, 7  ;;  %s1268_s7 = smov 46  }
 0x123   : > { %519 = vrot.lane.b32.xlu0 %v450_v8, %s1267_s10  ;;  %523 = vrot.lane.b32.xlu1 %v452_v6, %s1267_s10  ;;  %500 = vst.msk [vmem:[#allocation2 - $0x7] sm:$0x80] %vm499_vm4, %v1551_v50  ;;  %v465_v21 = vrot.slane %v452_v6, 7  ;;  %v466_v24 = vrot.slane %v453_v7, 7  ;;  %v467_v31 = vrot.slane %v454_v10, 7  ;;  %v468_v32 = vrot.slane %v455_v11, 7 }
 0x124   : > { %527 = vrot.lane.b32.xlu2 %v454_v10, %s1267_s10  ;;  %v478_v17 = vsel %vm429_vm2, %v470_v15, %v463_v14  ;;  %v477_v25 = vsel %vm429_vm2, %v463_v14, %v464_v20  ;;  %v469_v35 = vrot.slane %v456_v12, 7  ;;  %vm502_vm5 = vcmask 187392   ;;  %s886_s27 = sshll.u32 (%p1357_p9), %s1213_s17, 3  ;;  %s939_s28 = smul.u32 (%p1357_p9), 20, %s1217_s18 }
 0x125   : > { %v476_v26 = vsel %vm429_vm2, %v464_v20, %v465_v21  ;;  %v475_v27 = vsel %vm429_vm2, %v465_v21, %v466_v24  ;;  %v492_v29 = vsub.f32 %v451_v5, %v477_v25  ;;  %v474_v36 = vsel %vm429_vm2, %v466_v24, %v467_v31  ;;  %503 = vst.msk [vmem:[%s1555_s13] sm:$0xff] %vm502_vm5, %v1537_v16  ;;  %s601_s4 = ssub.s32 (%p1357_p9), 20, %s886_s27 }
 0x126   : > { %v493_v30 = vsub.f32 %v452_v6, %v476_v26  ;;  %v494_v33 = vsub.f32 %v453_v7, %v475_v27  ;;  %v473_v37 = vsel %vm429_vm2, %v467_v31, %v468_v32  ;;  %v472_v38 = vsel %vm429_vm2, %v468_v32, %v469_v35  ;;  %504 = vst.msk [vmem:[%s1555_s13 + $0x8] sm:$0xff] %vm502_vm5, %v1541_v28  ;;  %p602_p13 = scmp.lt.s32.totalorder (%p1357_p9), %s601_s4, 8  ;;  %s607_s25 = sadd.s32 (%p1357_p9), %s939_s28, %s886_s27 }
 0x127   : > { %v495_v39 = vsub.f32 %v454_v10, %v474_v36  ;;  %v496_v41 = vsub.f32 %v455_v11, %v473_v37  ;;  %v497_v42 = vsub.f32 %v456_v12, %v472_v38  ;;  %v471_v43 = vsel %vm429_vm2, %v469_v35, %v470_v15  ;;  %505 = vst.msk [vmem:[%s1555_s13 + $0x10] sm:$0xff] %vm502_vm5, %v1545_v40  ;;  %s889_s5 = sshll.u32 (%p1357_p9), %s607_s25, 3 }
 0x128   : > { %v1091_v18 = vld [vmem:[#allocation3] ss:$0 sm:$0xff]  ;;  %v498_v44 = vsub.f32 %v457_v13, %v471_v43  ;;  %506 = vst.msk [vmem:[%s1555_s13 + $0x18] sm:$0xff] %vm502_vm5, %v1549_v48  ;;  %vm543_vm6 = vcmask 375992   ;;  %vm584_vm7 = vcmask 564592   ;;  %s1674_s8 = scalar_lea.vmem (%p1357_p9), %s1743_s3, %s889_s5  }
 0x129   : > { %v483_v19 = vsel %vm407_vm0, %v1091_v18, %v478_v17  ;;  %501 = vst.msk [vmem:[#allocation3 - $0x7] sm:$0x80] %vm499_vm4, %v457_v13 }
 0x12a   : > { %v491_v23 = vsub.f32 %v450_v8, %v483_v19  ;;  %507 = vst.msk [vmem:[%s1555_s13 + $0x20] sm:$0xff] %vm502_vm5, %v1539_v22 }
 0x12b   : > { %521 = vrot.lane.b32.xlu0 %v451_v5, %s1267_s10  ;;  %525 = vrot.lane.b32.xlu1 %v453_v7, %s1267_s10  ;;  %508 = vst.msk [vmem:[%s1555_s13 + $0x28] sm:$0xff] %vm502_vm5, %v1543_v34 }
 0x12c   : > { %529 = vrot.lane.b32.xlu2 %v455_v11, %s1267_s10  ;;  %509 = vst.msk [vmem:[%s1555_s13 + $0x30] sm:$0xff] %vm502_vm5, %v1547_v46 }
 0x12d   : > { %510 = vst.msk [vmem:[%s1555_s13 + $0x38] sm:$0xff] %vm502_vm5, %v1551_v50 }
 0x133   : > { %531 = vrot.lane.b32.xlu0 %v456_v12, %s1267_s10  ;;  %533 = vrot.lane.b32.xlu1 %v457_v13, %s1267_s10 }
 0x134   : > { %560 = vrot.lane.b32.xlu2 %v491_v23, %s1268_s7 }
 0x13b   : > { %562 = vrot.lane.b32.xlu0 %v492_v29, %s1268_s7  ;;  %564 = vrot.lane.b32.xlu1 %v493_v30, %s1268_s7 }
 0x13c   : > { %566 = vrot.lane.b32.xlu2 %v494_v33, %s1268_s7 }
 0x143   : > { %568 = vrot.lane.b32.xlu0 %v495_v39, %s1268_s7  ;;  %570 = vrot.lane.b32.xlu1 %v496_v41, %s1268_s7 }
 0x144   : > { %572 = vrot.lane.b32.xlu2 %v497_v42, %s1268_s7 }
 0x14b   : > { %574 = vrot.lane.b32.xlu0 %v498_v44, %s1268_s7 }
 0x17e   : > { %v528_v9 = vpop.permute.xlu2 %527 }
 0x17f   : > { %548 = vst.msk [vmem:[%s1555_s13 + $0x20] sm:$0xff] %vm543_vm6, %v528_v9 }
 0x186   : > { %v530_v16 = vpop.permute.xlu2 %529 }
 0x187   : > { %549 = vst.msk [vmem:[%s1555_s13 + $0x28] sm:$0xff] %vm543_vm6, %v530_v16 }
 0x18e   : > { %v561_v28 = vpop.permute.xlu2 %560 }
 0x195   : > { %v520_v40 = vpop.permute.xlu0 %519  ;;  %v524_v22 = vpop.permute.xlu1 %523 }
 0x196   : > { %544 = vst.msk [vmem:[%s1555_s13] sm:$0xff] %vm543_vm6, %v520_v40  ;;  %v567_v34 = vpop.permute.xlu2 %566 }
 0x197   : > { %546 = vst.msk [vmem:[%s1555_s13 + $0x10] sm:$0xff] %vm543_vm6, %v524_v22 }
 0x198   : > { %585 = vst.msk [vmem:[%s1555_s13] sm:$0xff] %vm584_vm7, %v561_v28 }
 0x19d   : > { %v522_v45 = vpop.permute.xlu0 %521  ;;  %v526_v46 = vpop.permute.xlu1 %525 }
 0x19e   : > { %545 = vst.msk [vmem:[%s1555_s13 + $0x8] sm:$0xff] %vm543_vm6, %v522_v45  ;;  %v573_v47 = vpop.permute.xlu2 %572 }
 0x19f   : > { %547 = vst.msk [vmem:[%s1555_s13 + $0x18] sm:$0xff] %vm543_vm6, %v526_v46 }
 0x1a0   : > { %588 = vst.msk [vmem:[%s1555_s13 + $0x18] sm:$0xff] %vm584_vm7, %v567_v34 }
 0x1a5   : > { %v532_v48 = vpop.permute.xlu0 %531  ;;  %v534_v49 = vpop.permute.xlu1 %533 }
 0x1a6   : > { %550 = vst.msk [vmem:[%s1555_s13 + $0x30] sm:$0xff] %vm543_vm6, %v532_v48 }
 0x1a7   : > { %551 = vst.msk [vmem:[%s1555_s13 + $0x38] sm:$0xff] %vm543_vm6, %v534_v49 }
 0x1a8   : > { %591 = vst.msk [vmem:[%s1555_s13 + $0x30] sm:$0xff] %vm584_vm7, %v573_v47 }
 0x1ad   : > { %v563_v50 = vpop.permute.xlu0 %562  ;;  %v565_v51 = vpop.permute.xlu1 %564 }
 0x1ae   : > { %586 = vst.msk [vmem:[%s1555_s13 + $0x8] sm:$0xff] %vm584_vm7, %v563_v50 }
 0x1af   : > { %587 = vst.msk [vmem:[%s1555_s13 + $0x10] sm:$0xff] %vm584_vm7, %v565_v51 }
 0x1b5   : > { %v569_v52 = vpop.permute.xlu0 %568  ;;  %v571_v53 = vpop.permute.xlu1 %570 }
 0x1b6   : > { %589 = vst.msk [vmem:[%s1555_s13 + $0x20] sm:$0xff] %vm584_vm7, %v569_v52 }
 0x1b7   : > { %590 = vst.msk [vmem:[%s1555_s13 + $0x28] sm:$0xff] %vm584_vm7, %v571_v53 }
 0x1ba   : > { %599 = sbr.rel (!%p1357_p9) target bundleno = 489 (0x1e9), region = 48 }
 0x1bd   : > { %v575_v54 = vpop.permute.xlu0 %574 }
 0x1be   : > { %592 = vst.msk [vmem:[%s1555_s13 + $0x38] sm:$0xff] %vm584_vm7, %v575_v54 }
 0x1bf   : > { %s1770_s4 = smov (!%p602_p13, %s601_s4), 8 }
 0x1c0   : > { %s887_s12 = sshll.u32 %s1770_s4, 3 }
 0x1c1   : > { %p890_p2 = scmp.eq.s32.totalorder %s887_s12, 0 }
 0x1c2   : > { %s1678_s29 = sshrl.u32 (!%p890_p2), %s1770_s4, 3 }
 0x1c3   : > { %612 = sbr.rel (%p890_p2) target bundleno = 489 (0x1e9), region = 52  ;;  %p891_p9 = scmp.le.s32.totalorder (!%p890_p2), %s1678_s29, 0 }
 0x1c8   : > { %809 = sbr.rel (%p891_p9) target bundleno = 472 (0x1d8), region = 134  ;;  %s1749_s17 = smov (!%p891_p9), %s1674_s8 }
 0x1c9   : > { %s1750_s18 = smov (!%p891_p9), %s1555_s13  ;;  %s1687_s14 = smov (!%p891_p9), 0  }
 0x1ca   : > { %s1689_s11 = smov (!%p891_p9), 0  }
 0x1cd LB: >> { %v689_v55 = vld [vmem:[%s1237_s18] sm:$0xff]  ;;  %v691_v56 = vld [vmem:[%s1237_s18 + $0x8] sm:$0xff]  ;;  %v693_v57 = vld [vmem:[%s1237_s18 + $0x10] sm:$0xff]  ;;  %s705_s24 = sadd.s32 1, %s1241_s14  ;;  %s683_s11 = sadd.s32 1, %s1245_s11   ;;  %s1245_s11 = sphi %s1689_s11, %s683_s11   ;;  %s1241_s14 = sphi %s1687_s14, %s1752_s14   ;;  %s1237_s18 = sphi %s1750_s18, %s710_s18   ;;  %s1233_s17 = sphi %s1749_s17, %s1751_s17  }
 0x1ce   : >> { %690 = vst [vmem:[%s1233_s17] sm:$0xff] %v689_v55  ;;  %v695_v58 = vld [vmem:[%s1237_s18 + $0x18] sm:$0xff]  ;;  %p706_p3 = scmp.ge.s32.totalorder %s705_s24, %s1678_s29  ;;  %v697_v59 = vld [vmem:[%s1237_s18 + $0x20] sm:$0xff]  ;;  %v699_v60 = vld [vmem:[%s1237_s18 + $0x28] sm:$0xff]  ;;  %p682_p4 = scmp.ge.s32.totalorder %s683_s11, %s1678_s29 }
 0x1cf   : >> { %692 = vst [vmem:[%s1233_s17 + $0x8] sm:$0xff] %v691_v56  ;;  %v701_v61 = vld [vmem:[%s1237_s18 + $0x30] sm:$0xff]  ;;  %v703_v62 = vld [vmem:[%s1237_s18 + $0x38] sm:$0xff] }
 0x1d0   : >> { %694 = vst [vmem:[%s1233_s17 + $0x10] sm:$0xff] %v693_v57  ;;  %s1772_s24 = smov (%p706_p3, %s705_s24), 0 }
 0x1d1   : >> { %696 = vst [vmem:[%s1233_s17 + $0x18] sm:$0xff] %v695_v58  ;;  %s892_s26 = sshll.u32 %s1772_s24, 6  ;;  %s1752_s14 = smov %s1772_s24 }
 0x1d2   : >> { %698 = vst [vmem:[%s1233_s17 + $0x20] sm:$0xff] %v697_v59  ;;  %s710_s18 = scalar_lea.vmem %s1555_s13, %s892_s26 [#allocation7]   ;;  %s711_s9 = scalar_lea.vmem %s1674_s8, %s892_s26  }
 0x1d3   : >> { %700 = vst [vmem:[%s1233_s17 + $0x28] sm:$0xff] %v699_v60  ;;  %685 = sbr.rel (!%p682_p4) target bundleno = 461 (0x1cd), region = 140 }
 0x1d4   : >> { %702 = vst [vmem:[%s1233_s17 + $0x30] sm:$0xff] %v701_v61 }
 0x1d5   : >> { %704 = vst [vmem:[%s1233_s17 + $0x38] sm:$0xff] %v703_v62  ;;  %s1751_s17 = smov %s711_s9 }
 0x1d8 PF: > { %s1708_s23 = sand.u32 7, %s1770_s4   ;;  %s903_s10 = sshll.u32 %s1678_s29, 6 }
 0x1d9   : > { %s716_s7 = scalar_lea.vmem %s1555_s13, %s903_s10 [#allocation7]   ;;  %s718_s27 = scalar_lea.vmem %s1674_s8, %s903_s10  }
 0x1da   : > { %p897_p5 = scmp.le.s32.totalorder %s1708_s23, 0 }
 0x1db   : > { %s1247_s28 = smov (!%p897_p5), %s718_s27   ;;  %s1251_s25 = smov (!%p897_p5), %s716_s7  }
 0x1dc   : > { %823 = sbr.rel (%p897_p5) target bundleno = 489 (0x1e9), region = 145  ;;  %s1255_s5 = smov (!%p897_p5), 0  }
 0x1dd   : > { %s1259_s6 = smov (!%p897_p5), 0  }
 0x1e1 LB: >> { %v728_v63 = vld [vmem:[%s1253_s25] sm:$0xff]  ;;  %s730_s4 = sadd.s32 1, %s1257_s5  ;;  %s722_s6 = sadd.s32 1, %s1261_s6   ;;  %s1261_s6 = sphi %s1259_s6, %s722_s6   ;;  %s1257_s5 = sphi %s1255_s5, %s1256_s5   ;;  %s1253_s25 = sphi %s1251_s25, %s735_s25   ;;  %s1249_s28 = sphi %s1247_s28, %s736_s28  }
 0x1e2   : >> { %729 = vst [vmem:[%s1249_s28] sm:$0xff] %v728_v63  ;;  %p731_p6 = scmp.ge.s32.totalorder %s730_s4, %s1708_s23  ;;  %p721_p8 = scmp.ge.s32.totalorder %s722_s6, %s1708_s23 }
 0x1e4   : >> { %s1774_s4 = smov (%p731_p6, %s730_s4), 0  ;;  %724 = sbr.rel (!%p721_p8) target bundleno = 481 (0x1e1), region = 151 }
 0x1e5   : >> { %s898_s13 = sshll.u32 %s1774_s4, 3  ;;  %s1256_s5 = smov %s1774_s4  }
 0x1e6   : >> { %s735_s25 = scalar_lea.vmem %s716_s7, %s898_s13 [#allocation7]   ;;  %s736_s28 = scalar_lea.vmem %s718_s27, %s898_s13  }
 0x1e9 PF: > { %s17_s21 = sadd.s32 1, %s1229_s21   ;;  %s1753_s22 = sld [smem:[#allocation9_spill]] }
 0x1ea   : > { %p14_p10 = scmp.ge.s32.totalorder %s17_s21, 8   ;;  %s1754_s14 = smov %s1205_s15 }
 0x1eb   : > { %s1755_s15 = smov %s1209_s16  ;;  %s1756_s16 = smov %s1362_s30 }
 0x1ec   : > { %s1757_s17 = smov %s1221_s19  ;;  %s1758_s18 = smov %s1225_s20 }
 0x1ed   : > { %s1759_s19 = smov %s1762_s0  ;;  %16 = sbr.rel (!%p14_p10) target bundleno = 7 (0x7), region = 162 }
 0x1ef   : > { %s1760_s20 = smov %s1753_s22 }
 0x1f2   :  { %752 = vsyncpa [#allocation6], 1 }
 0x1f3   :  { %754 = vsyncpa [#allocation6 + $0x1], 1 }

</bundles_post_ra>
